<compile_context>
chip_gen: v7x
topology: tpu7x:2x2x1
jax: 0.10.0
libtpu: 0.0.40
codegen_flags: <defaults>
</compile_context>

<pallas_src>
import functools

import jax
import jax.numpy as jnp
from jax.experimental import pallas as pl
from jax.experimental.pallas import tpu as pltpu


def _round_up(n, m):
    return ((n + m - 1) // m) * m


def _vmem_capacity_bytes():
    """Physical VMEM per TensorCore; conservative 64 MiB fallback."""
    try:
        cap = getattr(pltpu.get_tpu_info(), "vmem_capacity_bytes", None)
        if cap:
            return int(cap)
    except Exception:
        pass
    return 64 * 1024 * 1024


def _pick_th(H_pad, th_target):
    """Largest multiple of 128 that divides H_pad and is <= th_target."""
    t = max(128, (min(th_target, H_pad) // 128) * 128)
    while t > 128:
        if H_pad % t == 0:
            return t
        t -= 128
    return 128


# ----------------------------------------------------------------------------
# Kernels: grid = (token_tiles, hidden_chunks); down-proj accumulated over H.
# ----------------------------------------------------------------------------
def _swiglu_kernel_accum_out(x_ref, w13_ref, b13_ref, w2_ref, b2_ref, o_ref, *, th):
    """f32 output: accumulate the down-projection directly into o_ref."""
    h = pl.program_id(1)

    @pl.when(h == 0)
    def _init():
        o_ref[...] = jnp.zeros_like(o_ref)

    x = x_ref[...].astype(w13_ref.dtype)                     # cast in-kernel
    h13 = jnp.dot(x, w13_ref[...], preferred_element_type=jnp.float32) + b13_ref[...]
    h1 = h13[:, :th]
    h3 = h13[:, th:]
    g = (h1 * jax.nn.sigmoid(h1)) * h3                       # silu(h1) * h3, f32
    o_ref[...] = o_ref[...] + jnp.dot(g.astype(w2_ref.dtype), w2_ref[...],
                                      preferred_element_type=jnp.float32)

    @pl.when(h == pl.num_programs(1) - 1)
    def _finalize():
        o_ref[...] = o_ref[...] + b2_ref[...]


def _swiglu_kernel_scratch_acc(x_ref, w13_ref, b13_ref, w2_ref, b2_ref, o_ref,
                               acc_ref, *, th):
    """Non-f32 output: f32 accumulate in VMEM scratch, cast on the last chunk."""
    h = pl.program_id(1)

    @pl.when(h == 0)
    def _init():
        acc_ref[...] = jnp.zeros_like(acc_ref)

    x = x_ref[...].astype(w13_ref.dtype)
    h13 = jnp.dot(x, w13_ref[...], preferred_element_type=jnp.float32) + b13_ref[...]
    h1 = h13[:, :th]
    h3 = h13[:, th:]
    g = (h1 * jax.nn.sigmoid(h1)) * h3
    acc_ref[...] += jnp.dot(g.astype(w2_ref.dtype), w2_ref[...],
                            preferred_element_type=jnp.float32)

    @pl.when(h == pl.num_programs(1) - 1)
    def _finalize():
        o_ref[...] = (acc_ref[...] + b2_ref[...]).astype(o_ref.dtype)


# ----------------------------------------------------------------------------
# One-time weight preparation (hoisted out of the forward call).
# ----------------------------------------------------------------------------
def prepare_swiglu_params(w1, b1, w2, b2, w3, b3, *, th=None,
                          compute_dtype=jnp.bfloat16):
    """Pad weights to MXU-friendly shapes, cast, and fuse w1|w3 chunk-wise."""
    D, H = w1.shape
    D_pad = _round_up(D, 128)
    H_pad = _round_up(H, 128)

    cap = _vmem_capacity_bytes()
    if th is None:
        th = 512 if cap >= 100 * 1024 * 1024 else 256
    th_eff = _pick_th(H_pad, th)
    nH = H_pad // th_eff

    # Zero-pad; padded H columns give h1=h3=0 -> silu(0)*0=0 -> zero contribution.
    w1p = jnp.pad(w1, ((0, D_pad - D), (0, H_pad - H))).astype(compute_dtype)
    w3p = jnp.pad(w3, ((0, D_pad - D), (0, H_pad - H))).astype(compute_dtype)
    # Chunk-interleave so hidden chunk h is the contiguous column window
    # [h*2*th, (h+1)*2*th): first th columns from w1, next th from w3.
    w13 = jnp.concatenate(
        [w1p.reshape(D_pad, nH, th_eff), w3p.reshape(D_pad, nH, th_eff)],
        axis=2).reshape(D_pad, 2 * H_pad)

    b1p = jnp.pad(b1, (0, H_pad - H)).astype(jnp.float32).reshape(nH, th_eff)
    b3p = jnp.pad(b3, (0, H_pad - H)).astype(jnp.float32).reshape(nH, th_eff)
    b13 = jnp.concatenate([b1p, b3p], axis=1).reshape(1, 2 * H_pad)

    w2p = jnp.pad(w2, ((0, H_pad - H), (0, D_pad - D))).astype(compute_dtype)
    b2p = jnp.pad(b2, (0, D_pad - D)).astype(jnp.float32).reshape(1, D_pad)

    return dict(w13=w13, b13=b13, w2=w2p, b2=b2p,
                dim=D, hidden=H, dim_pad=D_pad, hidden_pad=H_pad, th=th_eff)


# ----------------------------------------------------------------------------
# Forward call.
# ----------------------------------------------------------------------------
def swiglu_ffn(x, params, *, tm=None, out_dtype=None):
    """x: (batch, seq, dim) in f32/bf16; params from prepare_swiglu_params."""
    B, S, D = x.shape
    assert D == params["dim"], "dim mismatch with prepared params"
    D_pad = params["dim_pad"]
    H_pad = params["hidden_pad"]
    th = params["th"]
    w13, b13, w2p, b2p = params["w13"], params["b13"], params["w2"], params["b2"]

    M = B * S
    out_dtype = jnp.dtype(out_dtype) if out_dtype is not None else jnp.dtype(x.dtype)
    f32_out = out_dtype == jnp.dtype(jnp.float32)

    cap = _vmem_capacity_bytes()
    vmem_limit = int(cap * 0.85)          # headroom below physical VMEM
    if tm is None:
        tm = 1024 if cap >= 100 * 1024 * 1024 else 512

    # Token tile (sublane axis): multiple of 16 covers both f32 and bf16 packing.
    tm_eff = min(tm, _round_up(M, 16))

    # Shrink tm until the (double-buffered) working-set estimate fits comfortably.
    x_bytes = jnp.dtype(x.dtype).itemsize
    w_bytes = jnp.dtype(w13.dtype).itemsize
    o_bytes = out_dtype.itemsize

    def _vmem_estimate(t):
        return (2 * t * D_pad * x_bytes                 # x tiles
                + 2 * D_pad * 2 * th * w_bytes          # fused w1|w3 chunks
                + 2 * th * D_pad * w_bytes              # w2 chunks
                + 2 * t * D_pad * o_bytes               # output tile (+writeback)
                + (0 if f32_out else t * D_pad * 4)     # f32 accumulator scratch
                + 2 * t * 2 * th * 4)                   # h13 / gate f32 temporaries

    while tm_eff > 16 and _vmem_estimate(tm_eff) > int(vmem_limit * 0.8):
        tm_eff = max(16, _round_up(tm_eff // 2, 16))

    M_pad = _round_up(M, tm_eff)

    x2 = x.reshape(M, D)
    if M_pad != M or D_pad != D:
        # Padded rows produce garbage that is sliced off before reshape.
        x2 = jnp.pad(x2, ((0, M_pad - M), (0, D_pad - D)))

    grid = (M_pad // tm_eff, H_pad // th)

    in_specs = [
        pl.BlockSpec((tm_eff, D_pad), lambda i, h: (i, 0)),   # x tokens
        pl.BlockSpec((D_pad, 2 * th), lambda i, h: (0, h)),   # fused w1|w3 H-chunk
        pl.BlockSpec((1, 2 * th), lambda i, h: (0, h)),       # fused b1|b3 H-chunk
        pl.BlockSpec((th, D_pad), lambda i, h: (h, 0)),       # w2 H-chunk
        pl.BlockSpec((1, D_pad), lambda i, h: (0, 0)),        # b2
    ]
    out_spec = pl.BlockSpec((tm_eff, D_pad), lambda i, h: (i, 0))

    if f32_out:
        kernel = functools.partial(_swiglu_kernel_accum_out, th=th)
        scratch_shapes = []
    else:
        kernel = functools.partial(_swiglu_kernel_scratch_acc, th=th)
        scratch_shapes = [pltpu.VMEM((tm_eff, D_pad), jnp.float32)]

    out = pl.pallas_call(
        kernel,
        out_shape=jax.ShapeDtypeStruct((M_pad, D_pad), out_dtype),
        grid_spec=pltpu.PrefetchScalarGridSpec(
            num_scalar_prefetch=0,
            grid=grid,
            in_specs=in_specs,
            out_specs=out_spec,
            scratch_shapes=scratch_shapes,
        ),
        compiler_params=pltpu.CompilerParams(
            dimension_semantics=("parallel", "arbitrary"),
            vmem_limit_bytes=vmem_limit,
        ),
    )(x2, w13, b13, w2p, b2p)

    return out[:M, :D].reshape(B, S, D)


# ----------------------------------------------------------------------------
# Demo / self-test.
# ----------------------------------------------------------------------------
def make_params(key, dim, hidden_dim, multiple_of):
    # Same hidden_dim computation as the PyTorch module __init__.
    hidden_dim = int(2 * hidden_dim / 3)
    hidden_dim = multiple_of * ((hidden_dim + multiple_of - 1) // multiple_of)

    k1, k2, k3, k4, k5, k6 = jax.random.split(key, 6)
    scale_in = 1.0 / jnp.sqrt(dim)
    scale_h = 1.0 / jnp.sqrt(hidden_dim)
    # Stored as (in_features, out_features), i.e. transposed vs torch Linear.
    w1 = jax.random.uniform(k1, (dim, hidden_dim), jnp.float32, -scale_in, scale_in)
    b1 = jax.random.uniform(k2, (hidden_dim,), jnp.float32, -scale_in, scale_in)
    w3 = jax.random.uniform(k3, (dim, hidden_dim), jnp.float32, -scale_in, scale_in)
    b3 = jax.random.uniform(k4, (hidden_dim,), jnp.float32, -scale_in, scale_in)
    w2 = jax.random.uniform(k5, (hidden_dim, dim), jnp.float32, -scale_h, scale_h)
    b2 = jax.random.uniform(k6, (dim,), jnp.float32, -scale_h, scale_h)
    return w1, b1, w2, b2, w3, b3, hidden_dim


def reference_ffn(x, w1, b1, w2, b2, w3, b3):
    h1 = x @ w1 + b1
    h3 = x @ w3 + b3
    return (jax.nn.silu(h1) * h3) @ w2 + b2


if __name__ == "__main__":
    key = jax.random.PRNGKey(0)
    kx, kp = jax.random.split(key)

    dim = 32
    hidden_dim_arg = 64      # module rounds: int(2*64/3)=42 -> multiple_of 16 -> 48
    multiple_of = 16
    batch, seq = 2, 8

    w1, b1, w2, b2, w3, b3, hidden = make_params(kp, dim, hidden_dim_arg, multiple_of)
    x = jax.random.normal(kx, (batch, seq, dim), jnp.float32)

    y_ref = reference_ffn(x, w1, b1, w2, b2, w3, b3)

    # One-time weight preparation (hoisted out of the forward pass).
    params_f32 = prepare_swiglu_params(w1, b1, w2, b2, w3, b3,
                                       compute_dtype=jnp.float32)
    params_bf16 = prepare_swiglu_params(w1, b1, w2, b2, w3, b3,
                                        compute_dtype=jnp.bfloat16)

    # f32 compute + f32 out (accumulates directly into o_ref): near-exact.
    y_f32 = jax.block_until_ready(swiglu_ffn(x, params_f32))
    assert y_f32.shape == (batch, seq, dim)
    assert y_f32.dtype == jnp.float32
    assert jnp.allclose(y_f32, y_ref, atol=1e-4, rtol=1e-4), "f32 mismatch vs reference"

    # bf16 compute + bf16 out (production setting, scratch-accumulator path).
    y_bf16 = jax.block_until_ready(swiglu_ffn(x, params_bf16, out_dtype=jnp.bfloat16))
    assert y_bf16.shape == (batch, seq, dim)
    assert y_bf16.dtype == jnp.bfloat16
    assert jnp.allclose(y_bf16.astype(jnp.float32), y_ref, atol=1e-1, rtol=1e-1), \
        "bf16 mismatch vs reference"

    print("KERNEL_OK")
</pallas_src>

<mosaic_0001>
module attributes {stable_mosaic.version = 11 : i64} {
  func.func @_swiglu_kernel_accum_out(%arg0: i32, %arg1: i32, %arg2: memref<16x128xf32, #tpu.memory_space<vmem>>, %arg3: memref<128x256xf32, #tpu.memory_space<vmem>>, %arg4: memref<1x256xf32, #tpu.memory_space<vmem>>, %arg5: memref<128x128xf32, #tpu.memory_space<vmem>>, %arg6: memref<1x128xf32, #tpu.memory_space<vmem>>, %arg7: memref<16x128xf32, #tpu.memory_space<vmem>>) attributes {dimension_semantics = [#tpu.dimension_semantics<parallel>, #tpu.dimension_semantics<arbitrary>], iteration_bounds = array<i64: 1, 1>, scalar_prefetch = 0 : i64, scratch_operands = 0 : i64, tpu.core_type = #tpu.core_type<tc>, window_params = [{transform_indices = @transform_0, window_bounds = array<i64: 16, 128>}, {transform_indices = @transform_1, window_bounds = array<i64: 128, 256>}, {transform_indices = @transform_2, window_bounds = array<i64: 1, 256>}, {transform_indices = @transform_3, window_bounds = array<i64: 128, 128>}, {pipeline_mode = #tpu.pipeline_mode<synchronous>, transform_indices = @transform_4, window_bounds = array<i64: 1, 128>}, {transform_indices = @transform_5, window_bounds = array<i64: 16, 128>}]} {
    %c0_i32 = arith.constant 0 : i32
    %0 = arith.cmpi eq, %arg1, %c0_i32 : i32
    %1 = arith.extui %0 : i1 to i32
    %c0_i32_0 = arith.constant 0 : i32
    %2 = arith.cmpi ne, %1, %c0_i32_0 : i32
    scf.if %2 {
      %cst_16 = arith.constant 0.000000e+00 : f32
      %26 = vector.broadcast %cst_16 : f32 to vector<16x128xf32>
      %c0_17 = arith.constant 0 : index
      %c0_18 = arith.constant 0 : index
      %27 = vector.load %arg7[%c0_17, %c0_18] : memref<16x128xf32, #tpu.memory_space<vmem>>, vector<16x128xf32>
      tpu.vector_store %arg7[%c0_17, %c0_18], %26 {strides = array<i32>} : memref<16x128xf32, #tpu.memory_space<vmem>>, vector<16x128xf32>,
    } else {
    }
    %c0 = arith.constant 0 : index
    %c0_1 = arith.constant 0 : index
    %3 = vector.load %arg2[%c0, %c0_1] : memref<16x128xf32, #tpu.memory_space<vmem>>, vector<16x128xf32>
    %c0_2 = arith.constant 0 : index
    %c0_3 = arith.constant 0 : index
    %4 = vector.load %arg3[%c0_2, %c0_3] : memref<128x256xf32, #tpu.memory_space<vmem>>, vector<128x256xf32>
    %cst = arith.constant dense<0.000000e+00> : vector<16x256xf32>
    %5 = tpu.matmul %3, %4, %cst {dimension_numbers = #tpu.dot_dimension_numbers<[1], [0], [0], [1], [0, 0, 1, 1], [], []>} : vector<16x128xf32>, vector<128x256xf32>, vector<16x256xf32> -> vector<16x256xf32>
    %c0_4 = arith.constant 0 : index
    %c0_5 = arith.constant 0 : index
    %6 = vector.load %arg4[%c0_4, %c0_5] : memref<1x256xf32, #tpu.memory_space<vmem>>, vector<1x256xf32>
    %7 = vector.broadcast %6 : vector<1x256xf32> to vector<16x256xf32>
    %8 = arith.addf %5, %7 : vector<16x256xf32>
    %9 = vector.extract_strided_slice %8 {offsets = [0, 0], sizes = [16, 128], strides = [1, 1]} : vector<16x256xf32> to vector<16x128xf32>
    %10 = vector.extract_strided_slice %8 {offsets = [0, 128], sizes = [16, 128], strides = [1, 1]} : vector<16x256xf32> to vector<16x128xf32>
    %11 = arith.negf %9 : vector<16x128xf32>
    %12 = math.exp %11 : vector<16x128xf32>
    %cst_6 = arith.constant 1.000000e+00 : f32
    %13 = vector.broadcast %cst_6 : f32 to vector<16x128xf32>
    %14 = arith.addf %13, %12 : vector<16x128xf32>
    %15 = arith.divf %13, %14 : vector<16x128xf32>
    %16 = arith.mulf %9, %15 : vector<16x128xf32>
    %17 = arith.mulf %16, %10 : vector<16x128xf32>
    %c0_7 = arith.constant 0 : index
    %c0_8 = arith.constant 0 : index
    %18 = vector.load %arg7[%c0_7, %c0_8] : memref<16x128xf32, #tpu.memory_space<vmem>>, vector<16x128xf32>
    %c0_9 = arith.constant 0 : index
    %c0_10 = arith.constant 0 : index
    %19 = vector.load %arg5[%c0_9, %c0_10] : memref<128x128xf32, #tpu.memory_space<vmem>>, vector<128x128xf32>
    %cst_11 = arith.constant dense<0.000000e+00> : vector<16x128xf32>
    %20 = tpu.matmul %17, %19, %cst_11 {dimension_numbers = #tpu.dot_dimension_numbers<[1], [0], [0], [1], [0, 0, 1, 1], [], []>} : vector<16x128xf32>, vector<128x128xf32>, vector<16x128xf32> -> vector<16x128xf32>
    %21 = arith.addf %18, %20 : vector<16x128xf32>
    %c0_12 = arith.constant 0 : index
    %c0_13 = arith.constant 0 : index
    %22 = vector.load %arg7[%c0_12, %c0_13] : memref<16x128xf32, #tpu.memory_space<vmem>>, vector<16x128xf32>
    tpu.vector_store %arg7[%c0_12, %c0_13], %21 {strides = array<i32>} : memref<16x128xf32, #tpu.memory_space<vmem>>, vector<16x128xf32>,
    %c0_i32_14 = arith.constant 0 : i32
    %23 = arith.cmpi eq, %arg1, %c0_i32_14 : i32
    %24 = arith.extui %23 : i1 to i32
    %c0_i32_15 = arith.constant 0 : i32
    %25 = arith.cmpi ne, %24, %c0_i32_15 : i32
    scf.if %25 {
      %c0_16 = arith.constant 0 : index
      %c0_17 = arith.constant 0 : index
      %26 = vector.load %arg7[%c0_16, %c0_17] : memref<16x128xf32, #tpu.memory_space<vmem>>, vector<16x128xf32>
      %c0_18 = arith.constant 0 : index
      %c0_19 = arith.constant 0 : index
      %27 = vector.load %arg6[%c0_18, %c0_19] : memref<1x128xf32, #tpu.memory_space<vmem>>, vector<1x128xf32>
      %28 = vector.broadcast %27 : vector<1x128xf32> to vector<16x128xf32>
      %29 = arith.addf %26, %28 : vector<16x128xf32>
      %c0_20 = arith.constant 0 : index
      %c0_21 = arith.constant 0 : index
      %30 = vector.load %arg7[%c0_20, %c0_21] : memref<16x128xf32, #tpu.memory_space<vmem>>, vector<16x128xf32>
      tpu.vector_store %arg7[%c0_20, %c0_21], %29 {strides = array<i32>} : memref<16x128xf32, #tpu.memory_space<vmem>>, vector<16x128xf32>,
    } else {
    }
    return
  }
  func.func @transform_0(%arg0: i32, %arg1: i32) -> (i32, i32) {
    %c0_i32 = arith.constant 0 : i32
    %c0_i32_0 = arith.constant 0 : i32
    return %arg0, %c0_i32 : i32, i32
  }
  func.func @transform_1(%arg0: i32, %arg1: i32) -> (i32, i32) {
    %c0_i32 = arith.constant 0 : i32
    %c0_i32_0 = arith.constant 0 : i32
    return %c0_i32, %arg1 : i32, i32
  }
  func.func @transform_2(%arg0: i32, %arg1: i32) -> (i32, i32) {
    %c0_i32 = arith.constant 0 : i32
    %c0_i32_0 = arith.constant 0 : i32
    return %c0_i32, %arg1 : i32, i32
  }
  func.func @transform_3(%arg0: i32, %arg1: i32) -> (i32, i32) {
    %c0_i32 = arith.constant 0 : i32
    %c0_i32_0 = arith.constant 0 : i32
    return %arg1, %c0_i32 : i32, i32
  }
  func.func @transform_4(%arg0: i32, %arg1: i32) -> (i32, i32) {
    %c0_i32 = arith.constant 0 : i32
    %c0_i32_0 = arith.constant 0 : i32
    %c0_i32_1 = arith.constant 0 : i32
    return %c0_i32, %c0_i32_0 : i32, i32
  }
  func.func @transform_5(%arg0: i32, %arg1: i32) -> (i32, i32) {
    %c0_i32 = arith.constant 0 : i32
    %c0_i32_0 = arith.constant 0 : i32
    return %arg0, %c0_i32 : i32, i32
  }
}

</mosaic_0001>

<bundles_post_ra>
// kernel: tpu_custom_call.1
= control target key start
LH: loop header
LB: loop body
LE: loop exit
PB: predicated region body
PF: predicated region fallthrough
CT: control target
= control target key end

     0   :  { %10 = vsyncpa [#allocation3], 0  ;;  %s673_s0 = inlined_call_operand.hbm [shape: f32[16,128], index: 0, kind: input, shape index: {}]   ;;  %s674_s1 = inlined_call_operand.hbm [shape: f32[128,256], index: 1, kind: input, shape index: {}]   ;;  %s675_s2 = inlined_call_operand.vmem [shape: f32[1,256], index: 2, kind: input, shape index: {}]   ;;  %s676_s3 = inlined_call_operand.hbm [shape: f32[128,128], index: 3, kind: input, shape index: {}]   ;;  %s677_s4 = inlined_call_operand.vmem [shape: f32[1,128], index: 4, kind: input, shape index: {}]   ;;  %s678_s5 = inlined_call_operand.hbm [shape: f32[16,128], index: 5, kind: output, shape index: {}]  }
   0x1   :  { %11 = vsyncpa [#allocation6], 0 }
   0x2   :  { %12 = vsyncpa [#allocation4], 0  ;;  %s569_s18 = smov [#allocation5]   ;;  %s475_s22 = scalar_lea.hbm %s674_s1, 4096 }
   0x3   :  { %s30_s19 = sshll.u32 %s569_s18, 4  ;;  %p476_p0 = scmp.ne.s32.totalorder %s674_s1, %s475_s22  ;;  %s31_s19 = int_to_ptr.vmem [resolvable:$true] %s30_s19 }
   0x4   :  { %p479_p1 = scmp.lt.u32.totalorder %s475_s22, %s674_s1 }
   0x6   :  { %p481_p2 = pnand %p479_p1, %p476_p0 }
   0x8   :  { %484 = shalt.err (!%p481_p2)
}
   0x9   :  { %s485_s27 = scalar_lea.vmem %s31_s19, 4096  ;;  %p490_p4 = scmp.lt.s32.totalorder %s31_s19, %s31_s19 }
   0xa   :  { %p486_p3 = scmp.ne.s32.totalorder %s31_s19, %s485_s27  ;;  %p491_p5 = scmp.lt.s32.totalorder %s485_s27, %s485_s27 }
   0xc   :  { %p492_p6 = por %p491_p5, %p490_p4 }
   0xe   :  { %p493_p7 = pnand %p492_p6, %p486_p3 }
  0x10   :  { %496 = shalt.err (!%p493_p7)
}
  0x11   :  { %s570_s28 = smov 256   ;;  %s571_s29 = smov 16  }
  0x12   :  { %36 = dma.hbm_to_vmem [thread:$0]  %s674_s1, 4096, %s31_s19, [#allocation6], %s570_s28, %s570_s28, %s571_s29  }
  0x13   :  { %s572_s7 = smov [#allocation2]   ;;  %s497_s11 = scalar_lea.hbm %s673_s0, 256 }
  0x14   :  { %s18_s8 = sshll.u32 %s572_s7, 4  ;;  %p498_p8 = scmp.ne.s32.totalorder %s673_s0, %s497_s11  ;;  %s19_s8 = int_to_ptr.vmem [resolvable:$true] %s18_s8 }
  0x15   :  { %p501_p9 = scmp.lt.u32.totalorder %s497_s11, %s673_s0 }
  0x17   :  { %p503_p10 = pnand %p501_p9, %p498_p8 }
  0x19   :  { %506 = shalt.err (!%p503_p10)
}
  0x1a   :  { %s507_s16 = scalar_lea.vmem %s19_s8, 256  ;;  %p512_p12 = scmp.lt.s32.totalorder %s19_s8, %s19_s8 }
  0x1b   :  { %p508_p11 = scmp.ne.s32.totalorder %s19_s8, %s507_s16  ;;  %p513_p13 = scmp.lt.s32.totalorder %s507_s16, %s507_s16 }
  0x1d   :  { %p514_p0 = por %p513_p13, %p512_p12 }
  0x1f   :  { %p515_p1 = pnand %p514_p0, %p508_p11 }
  0x21   :  { %518 = shalt.err (!%p515_p1)
}
  0x22   :  { %s573_s1 = smov 128   ;;  %s574_s17 = smov 8  }
  0x23   :  { %24 = dma.hbm_to_vmem [thread:$0]  %s673_s0, 256, %s19_s8, [#allocation3], %s573_s1, %s573_s1, %s574_s17  }
  0x24   :  { %s575_s20 = smov [#allocation7]   ;;  %s519_s24 = scalar_lea.hbm %s676_s3, 2048 }
  0x25   :  { %s44_s21 = sshll.u32 %s575_s20, 4  ;;  %p520_p2 = scmp.ne.s32.totalorder %s676_s3, %s519_s24  ;;  %s45_s21 = int_to_ptr.vmem [resolvable:$true] %s44_s21 }
  0x26   :  { %p523_p3 = scmp.lt.u32.totalorder %s519_s24, %s676_s3 }
  0x28   :  { %p525_p4 = pnand %p523_p3, %p520_p2 }
  0x2a   :  { %528 = shalt.err (!%p525_p4)
}
  0x2b   :  { %s529_s29 = scalar_lea.vmem %s45_s21, 2048  ;;  %p534_p6 = scmp.lt.s32.totalorder %s45_s21, %s45_s21 }
  0x2c   :  { %p530_p5 = scmp.ne.s32.totalorder %s45_s21, %s529_s29  ;;  %p535_p7 = scmp.lt.s32.totalorder %s529_s29, %s529_s29 }
  0x2e   :  { %p536_p8 = por %p535_p7, %p534_p6 }
  0x30   :  { %p537_p9 = pnand %p536_p8, %p530_p5 }
  0x32   :  { %540 = shalt.err (!%p537_p9)
}
  0x33   :  { %50 = dma.hbm_to_vmem [thread:$0]  %s676_s3, 2048, %s45_s21, [#allocation6], %s573_s1, %s573_s1, %s574_s17  }
  0x34   :  { %563 = dma.done.wait [#allocation3], 256  }
  0x35   :  { %564 = vsyncadd [#allocation3], 4294967040 }
  0x36   :  { %565 = dma.done.wait [#allocation6], 6144  }
  0x37   :  { %566 = vsyncadd [#allocation6], 4294961152  ;;  %v576_v0 = vmov 0.0   ;;  %v71_v1 = vld [vmem:[#allocation5 + $0x8] sm:$0xff]  ;;  %v73_v2 = vld [vmem:[#allocation5 + $0x18] sm:$0xff]  ;;  %s577_s8 = smov [#allocation8]  }
  0x38   :  { %178 = vmatprep.mubr.f32.mxu0 %v576_v0  ;;  %v70_v3 = vld [vmem:[#allocation5] sm:$0xff]  ;;  %v394_v4 = vpack.c.bf16 %v73_v2, %v71_v1  ;;  %v72_v5 = vld [vmem:[#allocation5 + $0x10] sm:$0xff]  ;;  %v75_v6 = vld [vmem:[#allocation5 + $0x28] sm:$0xff]  ;;  %s325_s9 = sshll.u32 %s577_s8, 4  ;;  %s326_s9 = int_to_ptr.vmem [resolvable:$true] %s325_s9 }
  0x39   :  { %v77_v7 = vld [vmem:[#allocation5 + $0x38] sm:$0xff]  ;;  %v396_v8 = vpack.c.bf16 %v72_v5, %v70_v3  ;;  %v74_v10 = vld [vmem:[#allocation5 + $0x20] sm:$0xff]  ;;  %v76_v11 = vld [vmem:[#allocation5 + $0x30] sm:$0xff]  ;;  %s541_s10 = scalar_lea.vmem %s326_s9, 256  ;;  %p546_p11 = scmp.lt.s32.totalorder %s326_s9, %s326_s9 }
  0x3a   :  { %v398_v9 = vpack.c.bf16 %v77_v7, %v75_v6  ;;  %v79_v12 = vld [vmem:[#allocation5 + $0x48] sm:$0xff]  ;;  %395 = vmatprep.subr.bf16.mxu0 %v394_v4  ;;  %v81_v13 = vld [vmem:[#allocation5 + $0x58] sm:$0xff]  ;;  %v400_v14 = vpack.c.bf16 %v76_v11, %v74_v10  ;;  %v78_v16 = vld [vmem:[#allocation5 + $0x40] sm:$0xff]  ;;  %v104_v11 = vlaneseq  ;;  %p542_p10 = scmp.ne.s32.totalorder %s326_s9, %s541_s10  ;;  %p547_p12 = scmp.lt.s32.totalorder %s541_s10, %s541_s10 }
  0x3b   :  { %397 = vmatpush1.bf16.msra.mxu0 %v396_v8  ;;  %v402_v15 = vpack.c.bf16 %v81_v13, %v79_v12  ;;  %v80_v17 = vld [vmem:[#allocation5 + $0x50] sm:$0xff]  ;;  %v83_v18 = vld [vmem:[#allocation5 + $0x68] sm:$0xff]  ;;  %v85_v19 = vld [vmem:[#allocation5 + $0x78] sm:$0xff] }
  0x3c   :  { %399 = vmatprep.subr.bf16.mxu0 %v398_v9  ;;  %v404_v20 = vpack.c.bf16 %v80_v17, %v78_v16  ;;  %v406_v21 = vpack.c.bf16 %v85_v19, %v83_v18  ;;  %v82_v22 = vld [vmem:[#allocation5 + $0x60] sm:$0xff]  ;;  %v84_v23 = vld [vmem:[#allocation5 + $0x70] sm:$0xff]  ;;  %v87_v24 = vld [vmem:[#allocation5 + $0x88] sm:$0xff]  ;;  %v105_v12 = vshrl.u32 %v104_v11, 7  ;;  %p548_p13 = por %p547_p12, %p546_p11 }
  0x3d   :  { %v89_v25 = vld [vmem:[#allocation5 + $0x98] sm:$0xff]  ;;  %v408_v26 = vpack.c.bf16 %v84_v23, %v82_v22  ;;  %v86_v28 = vld [vmem:[#allocation5 + $0x80] sm:$0xff]  ;;  %v88_v29 = vld [vmem:[#allocation5 + $0x90] sm:$0xff] }
  0x3e   :  { %v410_v27 = vpack.c.bf16 %v89_v25, %v87_v24  ;;  %v91_v30 = vld [vmem:[#allocation5 + $0xa8] sm:$0xff]  ;;  %v93_v31 = vld [vmem:[#allocation5 + $0xb8] sm:$0xff]  ;;  %v412_v32 = vpack.c.bf16 %v88_v29, %v86_v28  ;;  %v90_v34 = vld [vmem:[#allocation5 + $0xa0] sm:$0xff]  ;;  %v106_v13 = vsub.s32 0, %v105_v12  ;;  %v110_v28 = vsub.s32 1, %v105_v12  ;;  %p549_p0 = pnand %p548_p13, %p542_p10 }
  0x3f   :  { %401 = vmatpush1.bf16.msra.mxu0 %v400_v14  ;;  %v414_v33 = vpack.c.bf16 %v93_v31, %v91_v30  ;;  %v92_v35 = vld [vmem:[#allocation5 + $0xb0] sm:$0xff]  ;;  %v95_v36 = vld [vmem:[#allocation5 + $0xc8] sm:$0xff]  ;;  %v97_v37 = vld [vmem:[#allocation5 + $0xd8] sm:$0xff] }
  0x40   :  { %403 = vmatprep.subr.bf16.mxu0 %v402_v15  ;;  %v416_v38 = vpack.c.bf16 %v92_v35, %v90_v34  ;;  %v418_v39 = vpack.c.bf16 %v97_v37, %v95_v36  ;;  %v94_v40 = vld [vmem:[#allocation5 + $0xc0] sm:$0xff]  ;;  %v96_v41 = vld [vmem:[#allocation5 + $0xd0] sm:$0xff]  ;;  %v99_v42 = vld [vmem:[#allocation5 + $0xe8] sm:$0xff] }
  0x41   :  { %v101_v43 = vld [vmem:[#allocation5 + $0xf8] sm:$0xff]  ;;  %v420_v44 = vpack.c.bf16 %v96_v41, %v94_v40  ;;  %v98_v46 = vld [vmem:[#allocation5 + $0xe0] sm:$0xff]  ;;  %v100_v47 = vld [vmem:[#allocation5 + $0xf0] sm:$0xff] }
  0x42   :  { %v422_v45 = vpack.c.bf16 %v101_v43, %v99_v42  ;;  %v424_v48 = vpack.c.bf16 %v100_v47, %v98_v46  ;;  %v68_v49 = vld [vmem:[#allocation2] sm:$0xff]  ;;  %v69_v50 = vld [vmem:[#allocation2 + $0x8] sm:$0xff]  ;;  %v209_v51 = vld [vmem:[#allocation7] sm:$0xff] }
  0x43   :  { %405 = vmatpush1.bf16.msra.mxu0 %v404_v20  ;;  %v210_v52 = vld [vmem:[#allocation7 + $0x8] sm:$0xff]  ;;  %v211_v54 = vld [vmem:[#allocation7 + $0x10] sm:$0xff]  ;;  %v212_v55 = vld [vmem:[#allocation7 + $0x18] sm:$0xff] }
  0x44   :  { %407 = vmatprep.subr.bf16.mxu0 %v406_v21  ;;  %v426_v53 = vpack.c.bf16 %v210_v52, %v209_v51  ;;  %v430_v56 = vpack.c.bf16 %v212_v55, %v211_v54  ;;  %v213_v57 = vld [vmem:[#allocation7 + $0x20] sm:$0xff]  ;;  %v214_v58 = vld [vmem:[#allocation7 + $0x28] sm:$0xff]  ;;  %v215_v60 = vld [vmem:[#allocation7 + $0x30] sm:$0xff] }
  0x45   :  { %v434_v59 = vpack.c.bf16 %v214_v58, %v213_v57  ;;  %v216_v61 = vld [vmem:[#allocation7 + $0x38] sm:$0xff]  ;;  %v217_v63 = vld [vmem:[#allocation7 + $0x40] sm:$0xff]  ;;  %v219_v2 = vld [vmem:[#allocation7 + $0x50] sm:$0xff] }
  0x46   :  { %427 = vmatprep.subr.bf16.mxu1 %v426_v53  ;;  %v438_v62 = vpack.c.bf16 %v216_v61, %v215_v60  ;;  %v220_v3 = vld [vmem:[#allocation7 + $0x58] sm:$0xff]  ;;  %v221_v5 = vld [vmem:[#allocation7 + $0x60] sm:$0xff]  ;;  %v222_v6 = vld [vmem:[#allocation7 + $0x68] sm:$0xff] }
  0x47   :  { %409 = vmatpush1.bf16.msra.mxu0 %v408_v26  ;;  %429 = vmatpush3.bf16.msra.mxu1 %v426_v53  ;;  %v446_v4 = vpack.c.bf16 %v220_v3, %v219_v2  ;;  %v450_v7 = vpack.c.bf16 %v222_v6, %v221_v5  ;;  %v223_v8 = vld [vmem:[#allocation7 + $0x70] sm:$0xff]  ;;  %v224_v9 = vld [vmem:[#allocation7 + $0x78] sm:$0xff] }
  0x48   :  { %411 = vmatprep.subr.bf16.mxu0 %v410_v27  ;;  %431 = vmatprep.subr.bf16.mxu1 %v430_v56  ;;  %v454_v10 = vpack.c.bf16 %v224_v9, %v223_v8  ;;  %v102_v14 = vld [vmem:[%s675_s2] sm:$0x3] }
  0x49   :  { %v107_v15 = vrot.slane %v102_v14, %v106_v13  ;;  %v111_v29 = vrot.slane %v102_v14, %v110_v28 }
  0x4b   :  { %413 = vmatpush1.bf16.msra.mxu0 %v412_v32  ;;  %433 = vmatpush3.bf16.msra.mxu1 %v430_v56 }
  0x4c   :  { %415 = vmatprep.subr.bf16.mxu0 %v414_v33  ;;  %435 = vmatprep.subr.bf16.mxu1 %v434_v59 }
  0x4f   :  { %417 = vmatpush1.bf16.msra.mxu0 %v416_v38  ;;  %437 = vmatpush3.bf16.msra.mxu1 %v434_v59 }
  0x50   :  { %419 = vmatprep.subr.bf16.mxu0 %v418_v39  ;;  %439 = vmatprep.subr.bf16.mxu1 %v438_v62  ;;  %v340_v39 = vld [vmem:[%s677_s4] ss:$0 sm:$0xff] }
  0x53   :  { %421 = vmatpush1.bf16.msra.mxu0 %v420_v44  ;;  %441 = vmatpush3.bf16.msra.mxu1 %v438_v62 }
  0x54   :  { %423 = vmatprep.subr.bf16.mxu0 %v422_v45 }
  0x57   :  { %425 = vmatpush1.bf16.msra.mxu0 %v424_v48 }
  0x5a   :  { %179 = vmatmul.mubr.f32.vlgmr.msra.gmra.mrb[0].mxu0 %v68_v49 }
  0x5b   :  { %184 = vmatprep.mubr.f32.mxu0 %v576_v0  ;;  %v218_v0 = vld [vmem:[#allocation7 + $0x48] sm:$0xff] }
  0x5c   :  { %v442_v1 = vpack.c.bf16 %v218_v0, %v217_v63 }
  0x5e   :  { %185 = vmatmul.mubr.f32.gmra.mrb[2].mxu0 %v69_v50  ;;  %443 = vmatprep.subr.bf16.mxu1 %v442_v1 }
  0x5f   :  { %445 = vmatpush3.bf16.msra.mxu1 %v442_v1 }
  0x60   :  { %447 = vmatprep.subr.bf16.mxu1 %v446_v4 }
  0x63   :  { %449 = vmatpush3.bf16.msra.mxu1 %v446_v4 }
  0x64   :  { %451 = vmatprep.subr.bf16.mxu1 %v450_v7 }
  0x67   :  { %453 = vmatpush3.bf16.msra.mxu1 %v450_v7 }
  0x68   :  { %455 = vmatprep.subr.bf16.mxu1 %v454_v10 }
  0x6b   :  { %457 = vmatpush3.bf16.msra.mxu1 %v454_v10 }
 0x12d   :  { %v180_v16 = vpop.f32.mrb[0].mxu0 }
 0x12e   :  { %v181_v17 = vadd.f32 %v180_v16, %v107_v15  ;;  %v182_v18 = vpop.f32.mrb[1].mxu0 }
 0x12f   :  { %v183_v31 = vadd.f32 %v182_v18, %v111_v29 }
 0x130   :  { %v338_v19 = vmul.f32 -1.442695, %v181_v17 }
 0x131   :  { %v186_v20 = vpop.f32.mrb[2].mxu0 }
 0x132   :  { %467 = vpow2.f32 %v338_v19  ;;  %v187_v21 = vadd.f32 %v186_v20, %v107_v15  ;;  %v188_v22 = vpop.f32.mrb[3].mxu0 }
 0x133   :  { %v189_v36 = vadd.f32 %v188_v22, %v111_v29 }
 0x134   :  { %v339_v23 = vmul.f32 -1.442695, %v187_v21 }
 0x136   :  { %469 = vpow2.f32 %v339_v23 }
 0x13c   :  { %v468_v24 = vpop.eup %467 }
 0x13d   :  { %v197_v25 = vadd.f32 1.0, %v468_v24 }
 0x13f   :  { %471 = vrcp.f32 %v197_v25 }
 0x140   :  { %v470_v26 = vpop.eup %469 }
 0x141   :  { %v198_v27 = vadd.f32 1.0, %v470_v26 }
 0x143   :  { %473 = vrcp.f32 %v198_v27 }
 0x149   :  { %v472_v30 = vpop.eup %471 }
 0x14a   :  { %v203_v32 = vmul.f32 %v472_v30, %v181_v17 }
 0x14c   :  { %v205_v33 = vmul.f32 %v203_v32, %v183_v31 }
 0x14d   :  { %v474_v34 = vpop.eup %473 }
 0x14e   :  { %v204_v35 = vmul.f32 %v474_v34, %v187_v21  ;;  %391 = vmatprep.mubr.f32.mxu1 %v205_v33 }
 0x150   :  { %v206_v37 = vmul.f32 %v204_v35, %v189_v36 }
 0x152   :  { %392 = vmatmul.mubr.f32.vlgmr.msra.gmra.mrb[0].mxu1 %v206_v37 }
 0x225   :  { %v393_v38 = vpop.f32.mrb[0].mxu1 }
 0x226   :  { %v291_v40 = vpop.f32.mrb[1].mxu1  ;;  %v317_v41 = vadd.f32 %v393_v38, %v340_v39 }
 0x227   :  { %v316_v42 = vadd.f32 %v340_v39, %v291_v40 }
 0x228   :  { %319 = vst [vmem:[#allocation8 + $0x8] sm:$0xff] %v317_v41 }
 0x229   :  { %318 = vst [vmem:[#allocation8] sm:$0xff] %v316_v42 }
 0x22a   :  { %552 = shalt.err (!%p549_p0)
}
 0x22b   :  { %s553_s13 = scalar_lea.hbm %s678_s5, 256 }
 0x22c   :  { %p554_p1 = scmp.ne.s32.totalorder %s678_s5, %s553_s13  ;;  %p557_p2 = scmp.lt.u32.totalorder %s553_s13, %s678_s5 }
 0x22e   :  { %p559_p3 = pnand %p557_p2, %p554_p1 }
 0x230   :  { %562 = shalt.err (!%p559_p3)
}
 0x231   :  { %331 = dma.vmem_to_hbm [thread:$0]  %s326_s9, 256, %s678_s5, [#allocation4], %s573_s1, %s573_s1, %s574_s17  }
 0x232   :  { %567 = dma.done.wait [#allocation4], 256  }
 0x233   :  { %568 = vsyncadd [#allocation4], 4294967040 }
 0x234   :  { %335 = vsyncpa [#allocation3], 1 }
 0x235   :  { %336 = vsyncpa [#allocation6], 1 }
 0x236   :  { %337 = vsyncpa [#allocation4], 1 }

</bundles_post_ra>
